<compile_context>
chip_gen: v7x
topology: tpu7x:2x2x1
jax: 0.10.0
libtpu: 0.0.40
codegen_flags: <defaults>
</compile_context>

<pallas_src>
import math

import jax
import jax.numpy as jnp
from jax.experimental import pallas as pl
from jax.experimental.pallas import tpu as pltpu

_LANES = 128                          # lane width: last dim multiple of 128 -> unmasked vst
_BLOCK_BYTE_BUDGET = 4 * 1024 * 1024  # ~4 MiB per block (per buffer)
_VMEM_LIMIT_BYTES = 32 * 1024 * 1024  # 4 x 4 MiB double-buffered residency fits easily


def _copy_kernel(x_ref, o_ref):
    # Pure DMA/VPU pass-through on the current lane-dense tile.
    o_ref[...] = x_ref[...]


def _block_rows_for(dtype, rows: int) -> int:
    """Dtype-aware, byte-budgeted row-block size (multiple of 32 sublanes)."""
    itemsize = jnp.dtype(dtype).itemsize
    budget_rows = _BLOCK_BYTE_BUDGET // (_LANES * itemsize)
    budget_rows = max(32, (budget_rows // 32) * 32)
    if rows <= budget_rows:
        # Single block equal to the full array: no (8,128) divisibility
        # requirement and no masking needed.
        return rows
    return budget_rows


def list_wrapper_forward(t: jax.Array) -> list[jax.Array]:
    """Pallas implementation of ListWrapper.forward: returns List[Tensor]."""
    orig_shape = t.shape
    total = math.prod(orig_shape) if orig_shape else 1

    if total == 0 or (total % _LANES) != 0:
        # Ragged lane tail (< 128 elements) or degenerate tensor: ListWrapper
        # owns no compute, so the exact, zero-HBM-traffic result is the input
        # itself (the true optimum for a pure pass-through).
        return [t]

    rows = total // _LANES
    itemsize = jnp.dtype(t.dtype).itemsize
    block_rows = _block_rows_for(t.dtype, rows)
    grid = (pl.cdiv(rows, block_rows),)

    # Pure-bitcast view of the contiguous tensor as a lane-dense slab:
    # no HBM traffic outside the kernel itself (1 read + 1 write total).
    x2d = t.reshape(rows, _LANES)

    out2d = pl.pallas_call(
        _copy_kernel,
        out_shape=jax.ShapeDtypeStruct((rows, _LANES), t.dtype),
        grid=grid,
        in_specs=[pl.BlockSpec((block_rows, _LANES), lambda i: (i, 0))],
        out_specs=pl.BlockSpec((block_rows, _LANES), lambda i: (i, 0)),
        # Donate/alias the input buffer: no second HBM allocation for an
        # identity pass-through.  (Callers must not rely on mutating `t`
        # afterwards; the values are unchanged since the copy is identity.)
        input_output_aliases={0: 0},
        cost_estimate=pl.CostEstimate(
            flops=0,
            transcendentals=0,
            bytes_accessed=2 * rows * _LANES * itemsize,
        ),
        compiler_params=pltpu.CompilerParams(
            dimension_semantics=("parallel",),
            vmem_limit_bytes=_VMEM_LIMIT_BYTES,
        ),
    )(x2d)

    return [out2d.reshape(orig_shape)]


if __name__ == "__main__":
    key = jax.random.PRNGKey(0)

    # Small NCHW input consistent with a typical NNAPI vision-model input.
    # total = 2*4*16*16 = 2048 elements = 16 lane-rows -> exercises the kernel.
    x = jax.random.normal(key, (2, 4, 16, 16), dtype=jnp.float32)
    outs = list_wrapper_forward(x)
    outs = [jax.block_until_ready(o) for o in outs]

    assert isinstance(outs, list) and len(outs) == 1
    assert outs[0].shape == x.shape and outs[0].dtype == x.dtype
    assert bool(jnp.all(outs[0] == x))

    # Ragged-tail path (total % 128 != 0): exact zero-traffic pass-through.
    y = jax.random.normal(key, (3, 5, 7), dtype=jnp.float32)
    outs_y = list_wrapper_forward(y)
    outs_y = [jax.block_until_ready(o) for o in outs_y]
    assert isinstance(outs_y, list) and len(outs_y) == 1
    assert bool(jnp.all(outs_y[0] == y))

    print("KERNEL_OK")
</pallas_src>

<mosaic_0001>
module attributes {stable_mosaic.version = 11 : i64} {
  func.func @_copy_kernel(%arg0: i32, %arg1: memref<16x128xf32, #tpu.memory_space<vmem>>, %arg2: memref<16x128xf32, #tpu.memory_space<vmem>>) attributes {dimension_semantics = [#tpu.dimension_semantics<parallel>], iteration_bounds = array<i64: 1>, scalar_prefetch = 0 : i64, scratch_operands = 0 : i64, tpu.core_type = #tpu.core_type<tc>, window_params = [{transform_indices = @transform_0, window_bounds = array<i64: 16, 128>}, {transform_indices = @transform_1, window_bounds = array<i64: 16, 128>}]} {
    %c0 = arith.constant 0 : index
    %c0_0 = arith.constant 0 : index
    %0 = vector.load %arg1[%c0, %c0_0] : memref<16x128xf32, #tpu.memory_space<vmem>>, vector<16x128xf32>
    %c0_1 = arith.constant 0 : index
    %c0_2 = arith.constant 0 : index
    %1 = vector.load %arg2[%c0_1, %c0_2] : memref<16x128xf32, #tpu.memory_space<vmem>>, vector<16x128xf32>
    tpu.vector_store %arg2[%c0_1, %c0_2], %0 {strides = array<i32>} : memref<16x128xf32, #tpu.memory_space<vmem>>, vector<16x128xf32>,
    return
  }
  func.func @transform_0(%arg0: i32) -> (i32, i32) {
    %c0_i32 = arith.constant 0 : i32
    %c0_i32_0 = arith.constant 0 : i32
    return %arg0, %c0_i32 : i32, i32
  }
  func.func @transform_1(%arg0: i32) -> (i32, i32) {
    %c0_i32 = arith.constant 0 : i32
    %c0_i32_0 = arith.constant 0 : i32
    return %arg0, %c0_i32 : i32, i32
  }
}

</mosaic_0001>

<bundles_post_ra>
// kernel: tpu_custom_call.1
= control target key start
LH: loop header
LB: loop body
LE: loop exit
PB: predicated region body
PF: predicated region fallthrough
CT: control target
= control target key end

     0   :  { %6 = vsyncpa [#allocation3], 0  ;;  %s134_s0 = inlined_call_operand.hbm [shape: f32[16,128], index: 0, kind: input, shape index: {}, may-alias: {0,1}]   ;;  %s135_s1 = inlined_call_operand.hbm [shape: f32[16,128], index: 1, kind: output, shape index: {}, may-alias: {0,1}]  }
   0x1   :  { %7 = vsyncpa [#allocation4], 0  ;;  %s96_s6 = smov [#allocation2]   ;;  %s48_s10 = scalar_lea.hbm %s134_s0, 256 }
   0x2   :  { %s13_s7 = sshll.u32 %s96_s6, 4  ;;  %p49_p0 = scmp.ne.s32.totalorder %s134_s0, %s48_s10  ;;  %s14_s7 = int_to_ptr.vmem [resolvable:$true] %s13_s7 }
   0x3   :  { %p52_p1 = scmp.lt.u32.totalorder %s48_s10, %s134_s0 }
   0x5   :  { %p54_p2 = pnand %p52_p1, %p49_p0 }
   0x7   :  { %57 = shalt.err (!%p54_p2)
}
   0x8   :  { %s58_s15 = scalar_lea.vmem %s14_s7, 256  ;;  %p63_p4 = scmp.lt.s32.totalorder %s14_s7, %s14_s7 }
   0x9   :  { %p59_p3 = scmp.ne.s32.totalorder %s14_s7, %s58_s15  ;;  %p64_p5 = scmp.lt.s32.totalorder %s58_s15, %s58_s15 }
   0xb   :  { %p65_p6 = por %p64_p5, %p63_p4 }
   0xd   :  { %p66_p7 = pnand %p65_p6, %p59_p3 }
   0xf   :  { %69 = shalt.err (!%p66_p7)
}
  0x10   :  { %s97_s16 = smov 128   ;;  %s98_s17 = smov 8  }
  0x11   :  { %19 = dma.hbm_to_vmem [thread:$0]  %s134_s0, 256, %s14_s7, [#allocation3], %s97_s16, %s97_s16, %s98_s17  }
  0x12   :  { %92 = dma.done.wait [#allocation3], 256  }
  0x13   :  { %93 = vsyncadd [#allocation3], 4294967040  ;;  %s99_s20 = smov [#allocation5]   ;;  %v23_v0 = vld [vmem:[#allocation2] sm:$0xff]  ;;  %v24_v1 = vld [vmem:[#allocation2 + $0x8] sm:$0xff] }
  0x14   :  { %s32_s21 = sshll.u32 %s99_s20, 4  ;;  %25 = vst [vmem:[#allocation5] sm:$0xff] %v23_v0  ;;  %26 = vst [vmem:[#allocation5 + $0x8] sm:$0xff] %v24_v1  ;;  %s33_s21 = int_to_ptr.vmem [resolvable:$true] %s32_s21 }
  0x15   :  { %s70_s22 = scalar_lea.vmem %s33_s21, 256  ;;  %p75_p9 = scmp.lt.s32.totalorder %s33_s21, %s33_s21 }
  0x16   :  { %p71_p8 = scmp.ne.s32.totalorder %s33_s21, %s70_s22  ;;  %p76_p10 = scmp.lt.s32.totalorder %s70_s22, %s70_s22 }
  0x18   :  { %p77_p11 = por %p76_p10, %p75_p9 }
  0x1a   :  { %p78_p12 = pnand %p77_p11, %p71_p8 }
  0x1c   :  { %81 = shalt.err (!%p78_p12)
}
  0x1d   :  { %s82_s0 = scalar_lea.hbm %s135_s1, 256 }
  0x1e   :  { %p83_p13 = scmp.ne.s32.totalorder %s135_s1, %s82_s0  ;;  %p86_p0 = scmp.lt.u32.totalorder %s82_s0, %s135_s1 }
  0x20   :  { %p88_p1 = pnand %p86_p0, %p83_p13 }
  0x22   :  { %91 = shalt.err (!%p88_p1)
}
  0x23   :  { %38 = dma.vmem_to_hbm [thread:$0]  %s33_s21, 256, %s135_s1, [#allocation4], %s97_s16, %s97_s16, %s98_s17  }
  0x24   :  { %94 = dma.done.wait [#allocation4], 256  }
  0x25   :  { %95 = vsyncadd [#allocation4], 4294967040 }
  0x26   :  { %42 = vsyncpa [#allocation3], 1 }
  0x27   :  { %43 = vsyncpa [#allocation4], 1 }

</bundles_post_ra>
